<compile_context>
chip_gen: v6e
topology: v6e:2x2x1
jax: 0.10.0
libtpu: 0.0.40
codegen_flags: <defaults>
</compile_context>

<pallas_src>
import jax
import jax.numpy as jnp
from jax.experimental import pallas as pl
from jax.experimental.pallas import tpu as pltpu

NEG_SLOPE = 0.01    # nn.LeakyReLU default negative_slope
BN_EPS = 1e-5       # nn.BatchNorm1d default eps
HEAD_PAD = 128      # classifier head padded to a lane-dense 128-wide output


def dnn2_feature_kernel(x_ref,
                        w1_ref, b1_ref,     # folded BN(59)  + Linear(59->128)
                        w2_ref, b2_ref,     # folded BN(128) + Linear(128->128)
                        w3_ref, b3_ref,     # folded BN(128) + Linear(128->128)
                        w4_ref, b4_ref,     # Linear(128 -> 128-padded head)
                        out_ref):
    # Leaky ReLU as a single VPU max (exact for 0 < slope < 1).
    def leaky_relu(h):
        return jnp.maximum(h, NEG_SLOPE * h)

    # In-kernel bf16 cast of the streamed f32 (TB, 59) tile; all dots use bf16
    # operands with f32 accumulation on the MXU.
    x = x_ref[...].astype(jnp.bfloat16)
    h = jnp.dot(x, w1_ref[...], preferred_element_type=jnp.float32)
    h = leaky_relu(h + b1_ref[...])

    h = jnp.dot(h.astype(jnp.bfloat16), w2_ref[...],
                preferred_element_type=jnp.float32)
    h = leaky_relu(h + b2_ref[...])

    h = jnp.dot(h.astype(jnp.bfloat16), w3_ref[...],
                preferred_element_type=jnp.float32)
    h = leaky_relu(h + b3_ref[...])

    # Lane-dense (TB, 128) store; padded columns carry zeros (sliced on host).
    out_ref[...] = (jnp.dot(h.astype(jnp.bfloat16), w4_ref[...],
                            preferred_element_type=jnp.float32)
                    + b4_ref[...])


def _round_up(n, m):
    return ((n + m - 1) // m) * m


def _cdiv(a, b):
    return -(-a // b)


def fold_params(params):
    """Fold each BN affine (y = x*s + t) into the following Linear; pad head.

    (x*s + t) @ W + b == x @ (diag(s) @ W) + (t @ W + b)
    Weights stored bf16 (MXU-native); biases stay f32. The final Linear is
    zero-padded to HEAD_PAD output columns for lane-dense stores.
    """
    s0, t0, w1, b1, s1, t1, w2, b2, s2, t2, w3, b3, w4, b4 = params

    w1f = w1 * s0.reshape(-1, 1)
    b1f = t0 @ w1 + b1
    w2f = w2 * s1.reshape(-1, 1)
    b2f = t1 @ w2 + b2
    w3f = w3 * s2.reshape(-1, 1)
    b3f = t2 @ w3 + b3

    out_c = w4.shape[-1]
    pad_c = HEAD_PAD - out_c
    w4p = jnp.pad(w4, ((0, 0), (0, pad_c)))
    b4p = jnp.pad(b4, ((0, 0), (0, pad_c)))

    return (w1f.astype(jnp.bfloat16), b1f.astype(jnp.float32),
            w2f.astype(jnp.bfloat16), b2f.astype(jnp.float32),
            w3f.astype(jnp.bfloat16), b3f.astype(jnp.float32),
            w4p.astype(jnp.bfloat16), b4p.astype(jnp.float32))


def dnn2_feature_forward(x, params, *, batch_tile=4096):
    """x: (B, 59) float32; params: raw (BN + Linear) params from make_params."""
    out_c = params[12].shape[-1]          # true head width (49 or 50)
    folded = fold_params(params)
    w1 = folded[0]

    B, F = x.shape
    assert F == w1.shape[0]

    # Batch tiling: TB is a multiple of 8 sublanes, sized so the per-step
    # pipeline overhead is amortized while padding stays minimal. At the
    # default batch_tile=4096 VMEM use is ~15 MiB (well under the v7x 64 MiB
    # per-TC budget) and the grid gets >= 2 steps once B > 4096 (megacore).
    B8 = _round_up(B, 8)
    n_steps = max(1, _cdiv(B8, batch_tile))
    TB = _round_up(_cdiv(B8, n_steps), 8)
    Bp = TB * n_steps
    if Bp != B:
        x = jnp.pad(x, ((0, Bp - B), (0, 0)))
    grid = (n_steps,)

    _const = lambda i: (0, 0)   # weights/biases: VMEM-resident, DMA'd once
    in_specs = [
        pl.BlockSpec((TB, F), lambda i: (i, 0)),          # raw f32 x tile
        pl.BlockSpec((F, 128), _const),      pl.BlockSpec((1, 128), _const),
        pl.BlockSpec((128, 128), _const),    pl.BlockSpec((1, 128), _const),
        pl.BlockSpec((128, 128), _const),    pl.BlockSpec((1, 128), _const),
        pl.BlockSpec((128, HEAD_PAD), _const), pl.BlockSpec((1, HEAD_PAD), _const),
    ]
    out_specs = pl.BlockSpec((TB, HEAD_PAD), lambda i: (i, 0))

    flops = 2 * Bp * (F * 128 + 128 * 128 + 128 * 128 + 128 * HEAD_PAD)
    bytes_accessed = (Bp * F * 4 + Bp * HEAD_PAD * 4                     # x in, out
                      + (F * 128 + 2 * 128 * 128 + 128 * HEAD_PAD) * 2   # bf16 weights
                      + (3 * 128 + HEAD_PAD) * 4)                        # f32 biases

    out = pl.pallas_call(
        dnn2_feature_kernel,
        out_shape=jax.ShapeDtypeStruct((Bp, HEAD_PAD), jnp.float32),
        grid=grid,
        in_specs=in_specs,
        out_specs=out_specs,
        compiler_params=pltpu.CompilerParams(
            dimension_semantics=("parallel",),
            vmem_limit_bytes=48 * 1024 * 1024),
        cost_estimate=pl.CostEstimate(flops=flops, transcendentals=0,
                                      bytes_accessed=bytes_accessed),
    )(x, *folded)

    # Drop batch padding and the zero-padded head columns on the host.
    return out[:B, :out_c]


def _init_linear(key, fan_in, fan_out):
    # PyTorch nn.Linear default init: U(-1/sqrt(fan_in), 1/sqrt(fan_in)).
    k_w, k_b = jax.random.split(key)
    bound = 1.0 / (fan_in ** 0.5)
    w = jax.random.uniform(k_w, (fan_in, fan_out), jnp.float32, -bound, bound)
    b = jax.random.uniform(k_b, (1, fan_out), jnp.float32, -bound, bound)
    return w, b


def _init_bn_folded(key, feat):
    # Deterministic (non-trivial) BN params / running stats, as scale+shift:
    # y = (x - mean) / sqrt(var + eps) * gamma + beta = x * scale + shift
    k1, k2, k3, k4 = jax.random.split(key, 4)
    gamma = jax.random.uniform(k1, (feat,), jnp.float32, 0.5, 1.5)
    beta = 0.1 * jax.random.normal(k2, (feat,), jnp.float32)
    mean = 0.1 * jax.random.normal(k3, (feat,), jnp.float32)
    var = jax.random.uniform(k4, (feat,), jnp.float32, 0.5, 1.5)
    scale = gamma / jnp.sqrt(var + BN_EPS)
    shift = beta - mean * scale
    return scale.reshape(1, feat), shift.reshape(1, feat)


def make_params(key, number_gesture=49, class_rest=False):
    output_class = number_gesture + int(class_rest is True)
    keys = jax.random.split(key, 7)
    s0, t0 = _init_bn_folded(keys[0], 59)
    w1, b1 = _init_linear(keys[1], 59, 128)
    s1, t1 = _init_bn_folded(keys[2], 128)
    w2, b2 = _init_linear(keys[3], 128, 128)
    s2, t2 = _init_bn_folded(keys[4], 128)
    w3, b3 = _init_linear(keys[5], 128, 128)
    w4, b4 = _init_linear(keys[6], 128, output_class)
    return (s0, t0, w1, b1, s1, t1, w2, b2, s2, t2, w3, b3, w4, b4)


def reference_forward(x, params):
    """Pure-f32 JAX reference of the eval-mode forward pass."""
    s0, t0, w1, b1, s1, t1, w2, b2, s2, t2, w3, b3, w4, b4 = params
    lrelu = lambda h: jnp.where(h > 0, h, NEG_SLOPE * h)
    h = x * s0 + t0
    h = lrelu(h @ w1 + b1)
    h = h * s1 + t1
    h = lrelu(h @ w2 + b2)
    h = h * s2 + t2
    h = lrelu(h @ w3 + b3)
    return h @ w4 + b4


if __name__ == "__main__":
    key = jax.random.PRNGKey(0)
    k_params, k_x = jax.random.split(key)

    params = make_params(k_params, number_gesture=49, class_rest=False)
    B = 8
    x = jax.random.normal(k_x, (B, 59), jnp.float32)

    out = dnn2_feature_forward(x, params)
    out = jax.block_until_ready(out)

    ref = reference_forward(x, params)
    assert out.shape == (B, 49), out.shape
    # bf16 matmul operands (f32 accumulation) vs pure-f32 reference => ~1e-2 err.
    assert jnp.allclose(out, ref, atol=5e-2, rtol=5e-2), "mismatch vs JAX reference"

    print("KERNEL_OK")
</pallas_src>

<mosaic_0001>
module attributes {stable_mosaic.version = 11 : i64} {
  func.func @dnn2_feature_kernel(%arg0: i32, %arg1: memref<8x59xf32, #tpu.memory_space<vmem>>, %arg2: memref<59x128xbf16, #tpu.memory_space<vmem>>, %arg3: memref<1x128xf32, #tpu.memory_space<vmem>>, %arg4: memref<128x128xbf16, #tpu.memory_space<vmem>>, %arg5: memref<1x128xf32, #tpu.memory_space<vmem>>, %arg6: memref<128x128xbf16, #tpu.memory_space<vmem>>, %arg7: memref<1x128xf32, #tpu.memory_space<vmem>>, %arg8: memref<128x128xbf16, #tpu.memory_space<vmem>>, %arg9: memref<1x128xf32, #tpu.memory_space<vmem>>, %arg10: memref<8x128xf32, #tpu.memory_space<vmem>>) attributes {dimension_semantics = [#tpu.dimension_semantics<parallel>], iteration_bounds = array<i64: 1>, scalar_prefetch = 0 : i64, scratch_operands = 0 : i64, tpu.core_type = #tpu.core_type<tc>, window_params = [{transform_indices = @transform_0, window_bounds = array<i64: 8, 59>}, {pipeline_mode = #tpu.pipeline_mode<synchronous>, transform_indices = @transform_1, window_bounds = array<i64: 59, 128>}, {pipeline_mode = #tpu.pipeline_mode<synchronous>, transform_indices = @transform_2, window_bounds = array<i64: 1, 128>}, {pipeline_mode = #tpu.pipeline_mode<synchronous>, transform_indices = @transform_3, window_bounds = array<i64: 128, 128>}, {pipeline_mode = #tpu.pipeline_mode<synchronous>, transform_indices = @transform_4, window_bounds = array<i64: 1, 128>}, {pipeline_mode = #tpu.pipeline_mode<synchronous>, transform_indices = @transform_5, window_bounds = array<i64: 128, 128>}, {pipeline_mode = #tpu.pipeline_mode<synchronous>, transform_indices = @transform_6, window_bounds = array<i64: 1, 128>}, {pipeline_mode = #tpu.pipeline_mode<synchronous>, transform_indices = @transform_7, window_bounds = array<i64: 128, 128>}, {pipeline_mode = #tpu.pipeline_mode<synchronous>, transform_indices = @transform_8, window_bounds = array<i64: 1, 128>}, {transform_indices = @transform_9, window_bounds = array<i64: 8, 128>}]} {
    %c0 = arith.constant 0 : index
    %c0_0 = arith.constant 0 : index
    %0 = vector.load %arg1[%c0, %c0_0] : memref<8x59xf32, #tpu.memory_space<vmem>>, vector<8x59xf32>
    %1 = arith.truncf %0 : vector<8x59xf32> to vector<8x59xbf16>
    %c0_1 = arith.constant 0 : index
    %c0_2 = arith.constant 0 : index
    %2 = vector.load %arg2[%c0_1, %c0_2] : memref<59x128xbf16, #tpu.memory_space<vmem>>, vector<59x128xbf16>
    %cst = arith.constant dense<0.000000e+00> : vector<8x128xf32>
    %3 = tpu.matmul %1, %2, %cst {dimension_numbers = #tpu.dot_dimension_numbers<[1], [0], [0], [1], [0, 0, 1, 1], [], []>} : vector<8x59xbf16>, vector<59x128xbf16>, vector<8x128xf32> -> vector<8x128xf32>
    %c0_3 = arith.constant 0 : index
    %c0_4 = arith.constant 0 : index
    %4 = vector.load %arg3[%c0_3, %c0_4] : memref<1x128xf32, #tpu.memory_space<vmem>>, vector<1x128xf32>
    %5 = vector.broadcast %4 : vector<1x128xf32> to vector<8x128xf32>
    %6 = arith.addf %3, %5 : vector<8x128xf32>
    %cst_5 = arith.constant 0.00999999977 : f32
    %7 = vector.broadcast %cst_5 : f32 to vector<8x128xf32>
    %8 = arith.mulf %7, %6 : vector<8x128xf32>
    %9 = arith.maximumf %6, %8 : vector<8x128xf32>
    %10 = arith.truncf %9 : vector<8x128xf32> to vector<8x128xbf16>
    %c0_6 = arith.constant 0 : index
    %c0_7 = arith.constant 0 : index
    %11 = vector.load %arg4[%c0_6, %c0_7] : memref<128x128xbf16, #tpu.memory_space<vmem>>, vector<128x128xbf16>
    %cst_8 = arith.constant dense<0.000000e+00> : vector<8x128xf32>
    %12 = tpu.matmul %10, %11, %cst_8 {dimension_numbers = #tpu.dot_dimension_numbers<[1], [0], [0], [1], [0, 0, 1, 1], [], []>} : vector<8x128xbf16>, vector<128x128xbf16>, vector<8x128xf32> -> vector<8x128xf32>
    %c0_9 = arith.constant 0 : index
    %c0_10 = arith.constant 0 : index
    %13 = vector.load %arg5[%c0_9, %c0_10] : memref<1x128xf32, #tpu.memory_space<vmem>>, vector<1x128xf32>
    %14 = vector.broadcast %13 : vector<1x128xf32> to vector<8x128xf32>
    %15 = arith.addf %12, %14 : vector<8x128xf32>
    %cst_11 = arith.constant 0.00999999977 : f32
    %16 = vector.broadcast %cst_11 : f32 to vector<8x128xf32>
    %17 = arith.mulf %16, %15 : vector<8x128xf32>
    %18 = arith.maximumf %15, %17 : vector<8x128xf32>
    %19 = arith.truncf %18 : vector<8x128xf32> to vector<8x128xbf16>
    %c0_12 = arith.constant 0 : index
    %c0_13 = arith.constant 0 : index
    %20 = vector.load %arg6[%c0_12, %c0_13] : memref<128x128xbf16, #tpu.memory_space<vmem>>, vector<128x128xbf16>
    %cst_14 = arith.constant dense<0.000000e+00> : vector<8x128xf32>
    %21 = tpu.matmul %19, %20, %cst_14 {dimension_numbers = #tpu.dot_dimension_numbers<[1], [0], [0], [1], [0, 0, 1, 1], [], []>} : vector<8x128xbf16>, vector<128x128xbf16>, vector<8x128xf32> -> vector<8x128xf32>
    %c0_15 = arith.constant 0 : index
    %c0_16 = arith.constant 0 : index
    %22 = vector.load %arg7[%c0_15, %c0_16] : memref<1x128xf32, #tpu.memory_space<vmem>>, vector<1x128xf32>
    %23 = vector.broadcast %22 : vector<1x128xf32> to vector<8x128xf32>
    %24 = arith.addf %21, %23 : vector<8x128xf32>
    %cst_17 = arith.constant 0.00999999977 : f32
    %25 = vector.broadcast %cst_17 : f32 to vector<8x128xf32>
    %26 = arith.mulf %25, %24 : vector<8x128xf32>
    %27 = arith.maximumf %24, %26 : vector<8x128xf32>
    %28 = arith.truncf %27 : vector<8x128xf32> to vector<8x128xbf16>
    %c0_18 = arith.constant 0 : index
    %c0_19 = arith.constant 0 : index
    %29 = vector.load %arg8[%c0_18, %c0_19] : memref<128x128xbf16, #tpu.memory_space<vmem>>, vector<128x128xbf16>
    %cst_20 = arith.constant dense<0.000000e+00> : vector<8x128xf32>
    %30 = tpu.matmul %28, %29, %cst_20 {dimension_numbers = #tpu.dot_dimension_numbers<[1], [0], [0], [1], [0, 0, 1, 1], [], []>} : vector<8x128xbf16>, vector<128x128xbf16>, vector<8x128xf32> -> vector<8x128xf32>
    %c0_21 = arith.constant 0 : index
    %c0_22 = arith.constant 0 : index
    %31 = vector.load %arg9[%c0_21, %c0_22] : memref<1x128xf32, #tpu.memory_space<vmem>>, vector<1x128xf32>
    %32 = vector.broadcast %31 : vector<1x128xf32> to vector<8x128xf32>
    %33 = arith.addf %30, %32 : vector<8x128xf32>
    %c0_23 = arith.constant 0 : index
    %c0_24 = arith.constant 0 : index
    %34 = vector.load %arg10[%c0_23, %c0_24] : memref<8x128xf32, #tpu.memory_space<vmem>>, vector<8x128xf32>
    tpu.vector_store %arg10[%c0_23, %c0_24], %33 {strides = array<i32>} : memref<8x128xf32, #tpu.memory_space<vmem>>, vector<8x128xf32>,
    return
  }
  func.func @transform_0(%arg0: i32) -> (i32, i32) {
    %c0_i32 = arith.constant 0 : i32
    %c0_i32_0 = arith.constant 0 : i32
    return %arg0, %c0_i32 : i32, i32
  }
  func.func @transform_1(%arg0: i32) -> (i32, i32) {
    %c0_i32 = arith.constant 0 : i32
    %c0_i32_0 = arith.constant 0 : i32
    %c0_i32_1 = arith.constant 0 : i32
    return %c0_i32, %c0_i32_0 : i32, i32
  }
  func.func @transform_2(%arg0: i32) -> (i32, i32) {
    %c0_i32 = arith.constant 0 : i32
    %c0_i32_0 = arith.constant 0 : i32
    %c0_i32_1 = arith.constant 0 : i32
    return %c0_i32, %c0_i32_0 : i32, i32
  }
  func.func @transform_3(%arg0: i32) -> (i32, i32) {
    %c0_i32 = arith.constant 0 : i32
    %c0_i32_0 = arith.constant 0 : i32
    %c0_i32_1 = arith.constant 0 : i32
    return %c0_i32, %c0_i32_0 : i32, i32
  }
  func.func @transform_4(%arg0: i32) -> (i32, i32) {
    %c0_i32 = arith.constant 0 : i32
    %c0_i32_0 = arith.constant 0 : i32
    %c0_i32_1 = arith.constant 0 : i32
    return %c0_i32, %c0_i32_0 : i32, i32
  }
  func.func @transform_5(%arg0: i32) -> (i32, i32) {
    %c0_i32 = arith.constant 0 : i32
    %c0_i32_0 = arith.constant 0 : i32
    %c0_i32_1 = arith.constant 0 : i32
    return %c0_i32, %c0_i32_0 : i32, i32
  }
  func.func @transform_6(%arg0: i32) -> (i32, i32) {
    %c0_i32 = arith.constant 0 : i32
    %c0_i32_0 = arith.constant 0 : i32
    %c0_i32_1 = arith.constant 0 : i32
    return %c0_i32, %c0_i32_0 : i32, i32
  }
  func.func @transform_7(%arg0: i32) -> (i32, i32) {
    %c0_i32 = arith.constant 0 : i32
    %c0_i32_0 = arith.constant 0 : i32
    %c0_i32_1 = arith.constant 0 : i32
    return %c0_i32, %c0_i32_0 : i32, i32
  }
  func.func @transform_8(%arg0: i32) -> (i32, i32) {
    %c0_i32 = arith.constant 0 : i32
    %c0_i32_0 = arith.constant 0 : i32
    %c0_i32_1 = arith.constant 0 : i32
    return %c0_i32, %c0_i32_0 : i32, i32
  }
  func.func @transform_9(%arg0: i32) -> (i32, i32) {
    %c0_i32 = arith.constant 0 : i32
    %c0_i32_0 = arith.constant 0 : i32
    return %arg0, %c0_i32 : i32, i32
  }
}

</mosaic_0001>

<bundles_post_ra>
// kernel: tpu_custom_call.1
= control target key start
LH: loop header
LB: loop body
LE: loop exit
PB: predicated region body
PF: predicated region fallthrough
CT: control target
= control target key end

     0   :  { %14 = vsyncpa [#allocation3], 0  ;;  %s994_s0 = inlined_call_operand.hbm [shape: f32[8,59], index: 0, kind: input, shape index: {}]   ;;  %s995_s1 = inlined_call_operand.hbm [shape: bf16[59,128], index: 1, kind: input, shape index: {}]   ;;  %s996_s2 = inlined_call_operand.vmem [shape: f32[1,128], index: 2, kind: input, shape index: {}]   ;;  %s997_s3 = inlined_call_operand.hbm [shape: bf16[128,128], index: 3, kind: input, shape index: {}]   ;;  %s998_s4 = inlined_call_operand.vmem [shape: f32[1,128], index: 4, kind: input, shape index: {}]   ;;  %s999_s5 = inlined_call_operand.hbm [shape: bf16[128,128], index: 5, kind: input, shape index: {}]   ;;  %s1000_s6 = inlined_call_operand.vmem [shape: f32[1,128], index: 6, kind: input, shape index: {}]   ;;  %s1001_s7 = inlined_call_operand.hbm [shape: bf16[128,128], index: 7, kind: input, shape index: {}]   ;;  %s1002_s8 = inlined_call_operand.vmem [shape: f32[1,128], index: 8, kind: input, shape index: {}]   ;;  %s1003_s9 = inlined_call_operand.hbm [shape: f32[8,128], index: 9, kind: output, shape index: {}]  }
   0x1   :  { %15 = vsyncpa [#allocation6], 0 }
   0x2   :  { %16 = vsyncpa [#allocation9], 0 }
   0x3   :  { %17 = vsyncpa [#allocation4], 0  ;;  %s855_s30 = smov [#allocation5]  }
   0x4   :  { %s33_s10 = sshll.u32 %s855_s30, 4  ;;  %s34_s10 = int_to_ptr.vmem [resolvable:$true] %s33_s10 }
   0x5   :  { %s735_s11 = scalar_lea.vmem %s34_s10, 512  ;;  %p740_p1 = scmp.lt.s32.totalorder %s34_s10, %s34_s10 }
   0x6   :  { %p736_p0 = scmp.ne.s32.totalorder %s34_s10, %s735_s11  ;;  %p741_p2 = scmp.lt.s32.totalorder %s735_s11, %s735_s11 }
   0x8   :  { %p742_p3 = por %p741_p2, %p740_p1 }
   0xa   :  { %p743_p4 = pnand %p742_p3, %p736_p0 }
   0xc   :  { %746 = shalt.err (!%p743_p4)
}
   0xd   :  { %s856_s12 = smov 64   ;;  %s857_s13 = smov 4  }
   0xe   :  { %39 = dma.hbm_to_vmem [thread:$0]  %s995_s1, 512, %s34_s10, [#allocation6], %s856_s12, %s856_s12, %s857_s13  }
   0xf   :  { %s858_s16 = smov [#allocation8]   ;;  %s859_s18 = smov [#allocation2]  }
  0x10   :  { %s61_s17 = sshll.u32 %s858_s16, 4  ;;  %s24_s19 = sshll.u32 %s859_s18, 4  ;;  %s62_s17 = int_to_ptr.vmem [resolvable:$true] %s61_s17  ;;  %s25_s19 = int_to_ptr.vmem [resolvable:$true] %s24_s19 }
  0x11   :  { %s755_s20 = scalar_lea.vmem %s62_s17, 1024  ;;  %p760_p6 = scmp.lt.s32.totalorder %s62_s17, %s62_s17 }
  0x12   :  { %p756_p5 = scmp.ne.s32.totalorder %s62_s17, %s755_s20  ;;  %p761_p7 = scmp.lt.s32.totalorder %s755_s20, %s755_s20 }
  0x14   :  { %p762_p8 = por %p761_p7, %p760_p6 }
  0x16   :  { %p763_p9 = pnand %p762_p8, %p756_p5 }
  0x18   :  { %766 = shalt.err (!%p763_p9)
}
  0x19   :  { %67 = dma.hbm_to_vmem [thread:$0]  %s999_s5, 1024, %s62_s17, [#allocation9], %s856_s12, %s856_s12, %s857_s13  }
  0x1a   :  { %s775_s1 = scalar_lea.vmem %s25_s19, 128  ;;  %p780_p11 = scmp.lt.s32.totalorder %s25_s19, %s25_s19 }
  0x1b   :  { %p776_p10 = scmp.ne.s32.totalorder %s25_s19, %s775_s1  ;;  %p781_p12 = scmp.lt.s32.totalorder %s775_s1, %s775_s1 }
  0x1d   :  { %p782_p13 = por %p781_p12, %p780_p11 }
  0x1f   :  { %p783_p0 = pnand %p782_p13, %p776_p10 }
  0x21   :  { %786 = shalt.err (!%p783_p0)
}
  0x22   :  { %27 = dma.hbm_to_vmem [thread:$0]  %s994_s0, 128, %s25_s19, [#allocation3]  }
  0x23   :  { %s860_s25 = smov [#allocation7]   ;;  %s861_s27 = smov [#allocation10]  }
  0x24   :  { %s47_s26 = sshll.u32 %s860_s25, 4  ;;  %s75_s28 = sshll.u32 %s861_s27, 4  ;;  %s48_s26 = int_to_ptr.vmem [resolvable:$true] %s47_s26  ;;  %s76_s28 = int_to_ptr.vmem [resolvable:$true] %s75_s28 }
  0x25   :  { %s795_s29 = scalar_lea.vmem %s48_s26, 1024  ;;  %p800_p2 = scmp.lt.s32.totalorder %s48_s26, %s48_s26 }
  0x26   :  { %p796_p1 = scmp.ne.s32.totalorder %s48_s26, %s795_s29  ;;  %p801_p3 = scmp.lt.s32.totalorder %s795_s29, %s795_s29 }
  0x28   :  { %p802_p4 = por %p801_p3, %p800_p2 }
  0x2a   :  { %p803_p5 = pnand %p802_p4, %p796_p1 }
  0x2c   :  { %806 = shalt.err (!%p803_p5)
}
  0x2d   :  { %53 = dma.hbm_to_vmem [thread:$0]  %s997_s3, 1024, %s48_s26, [#allocation6], %s856_s12, %s856_s12, %s857_s13  }
  0x2e   :  { %s815_s0 = scalar_lea.vmem %s76_s28, 1024  ;;  %p820_p7 = scmp.lt.s32.totalorder %s76_s28, %s76_s28 }
  0x2f   :  { %p816_p6 = scmp.ne.s32.totalorder %s76_s28, %s815_s0  ;;  %p821_p8 = scmp.lt.s32.totalorder %s815_s0, %s815_s0 }
  0x31   :  { %p822_p9 = por %p821_p8, %p820_p7 }
  0x33   :  { %p823_p10 = pnand %p822_p9, %p816_p6 }
  0x35   :  { %826 = shalt.err (!%p823_p10)
}
  0x36   :  { %81 = dma.hbm_to_vmem [thread:$0]  %s1001_s7, 1024, %s76_s28, [#allocation9], %s856_s12, %s856_s12, %s857_s13  }
  0x37   :  { %847 = dma.done.wait [#allocation3], 128  }
  0x38   :  { %848 = vsyncadd [#allocation3], 4294967168 }
  0x39   :  { %849 = dma.done.wait [#allocation6], 1536  }
  0x3a   :  { %850 = vsyncadd [#allocation6], 4294965760 }
  0x3b   :  { %851 = dma.done.wait [#allocation9], 2048  }
  0x3c   :  { %852 = vsyncadd [#allocation9], 4294965248  ;;  %vm144_vm0 = vcmask 1044480   ;;  %v862_v0 = vmov 0.0   ;;  %vm863_vm1 = vmmov 0   ;;  %vm145_vm2 = vcmask 1045504  }
  0x3d   :  { %616 = vmatprep.subr.bf16.mxu0 %v862_v0  ;;  %628 = vmatprep.subr.bf16.mxu1 %v862_v0  ;;  %v864_v1 = vmov 65535   ;;  %v699_v4 = vld [vmem:[#allocation5 + $0x18] sm:$0x3f]   ;;  %v700_v6 = vld [vmem:[#allocation5 + $0x10] sm:$0xff]   ;;  %v701_v9 = vld [vmem:[#allocation5 + $0x8] sm:$0xff]   ;;  %vm140_vm3 = vcmask 482304  }
  0x3e   :  { %624 = vmatprep.mubr.msk.bf16.mxu0 %vm863_vm1, %v862_v0  ;;  %644 = vmatprep.mubr.msk.bf16.mxu1 %vm863_vm1, %v862_v0  ;;  %v146_v2 = vsel %vm144_vm0, 4294967295, %v864_v1  ;;  %v703_v7 = vld [vmem:[#allocation7 + $0x38] sm:$0xff]   ;;  %v704_v8 = vld [vmem:[#allocation7 + $0x30] sm:$0xff]   ;;  %v702_v10 = vld [vmem:[#allocation5] sm:$0xff]   ;;  %s865_s16 = smov [#allocation11]  }
  0x3f   :  { %v147_v3 = vsel %vm145_vm2, %v146_v2, 0  ;;  %629 = vmatpush3.bf16.msra.mxu1 %v703_v7  ;;  %v100_v11 = vld [vmem:[#allocation2] sm:$0xff]  ;;  %v705_v12 = vld [vmem:[#allocation7 + $0x28] sm:$0xff]   ;;  %v706_v13 = vld [vmem:[#allocation7 + $0x20] sm:$0xff]   ;;  %s540_s17 = sshll.u32 %s865_s16, 4  ;;  %s541_s17 = int_to_ptr.vmem [resolvable:$true] %s540_s17 }
  0x40   :  { %v149_v5 = vand.u32 %v699_v4, %v147_v3  ;;  %630 = vmatprep.subr.bf16.mxu1 %v862_v0  ;;  %v101_v14 = vpack.c.bf16 %v100_v11, %v100_v11  ;;  %v707_v15 = vld [vmem:[#allocation7 + $0x18] sm:$0xff]   ;;  %v708_v16 = vld [vmem:[#allocation7 + $0x10] sm:$0xff]   ;;  %v709_v17 = vld [vmem:[#allocation7 + $0x8] sm:$0xff]   ;;  %p832_p12 = scmp.lt.s32.totalorder %s541_s17, %s541_s17 }
  0x41   :  { %v710_v18 = vld [vmem:[#allocation7] sm:$0xff]   ;;  %v711_v19 = vld [vmem:[#allocation8 + $0x38] sm:$0xff]   ;;  %v712_v20 = vld [vmem:[#allocation8 + $0x30] sm:$0xff]  }
  0x42   :  { %617 = vmatpush3.bf16.msra.mxu0 %v149_v5  ;;  %v713_v21 = vld [vmem:[#allocation8 + $0x28] sm:$0xff]   ;;  %v714_v22 = vld [vmem:[#allocation8 + $0x20] sm:$0xff]   ;;  %v715_v23 = vld [vmem:[#allocation8 + $0x18] sm:$0xff]  }
  0x43   :  { %618 = vmatprep.subr.bf16.mxu0 %v862_v0  ;;  %631 = vmatpush3.bf16.msra.mxu1 %v704_v8  ;;  %v716_v24 = vld [vmem:[#allocation8 + $0x10] sm:$0xff]   ;;  %v551_v25 = vld [vmem:[%s996_s2] ss:$0 sm:$0xff]  ;;  %v717_v34 = vld [vmem:[#allocation8 + $0x8] sm:$0xff]  }
  0x44   :  { %632 = vmatprep.subr.bf16.mxu1 %v862_v0  ;;  %v718_v35 = vld [vmem:[#allocation8] sm:$0xff]   ;;  %v719_v36 = vld [vmem:[#allocation10 + $0x38] sm:$0xff]   ;;  %v720_v37 = vld [vmem:[#allocation10 + $0x30] sm:$0xff]  }
  0x45   :  { %v721_v38 = vld [vmem:[#allocation10 + $0x28] sm:$0xff]   ;;  %v722_v39 = vld [vmem:[#allocation10 + $0x20] sm:$0xff]   ;;  %v723_v40 = vld [vmem:[#allocation10 + $0x18] sm:$0xff]  }
  0x46   :  { %619 = vmatpush3.bf16.msra.mxu0 %v700_v6  ;;  %v724_v41 = vld [vmem:[#allocation10 + $0x10] sm:$0xff]   ;;  %v557_v42 = vld [vmem:[%s998_s4] ss:$0 sm:$0xff]  ;;  %v725_v51 = vld [vmem:[#allocation10 + $0x8] sm:$0xff]  }
  0x47   :  { %620 = vmatprep.subr.bf16.mxu0 %v862_v0  ;;  %633 = vmatpush3.bf16.msra.mxu1 %v705_v12  ;;  %v726_v52 = vld [vmem:[#allocation10] sm:$0xff]   ;;  %v566_v53 = vld [vmem:[%s1000_s6] ss:$0 sm:$0xff]  ;;  %s827_s6 = scalar_lea.vmem %s541_s17, 128 }
  0x48   :  { %634 = vmatprep.subr.bf16.mxu1 %v862_v0  ;;  %v575_v62 = vld [vmem:[%s1002_s8] ss:$0 sm:$0xff]  ;;  %p828_p11 = scmp.ne.s32.totalorder %s541_s17, %s827_s6  ;;  %p833_p13 = scmp.lt.s32.totalorder %s827_s6, %s827_s6 }
  0x4a   :  { %621 = vmatpush3.bf16.msra.mxu0 %v701_v9  ;;  %p834_p0 = por %p833_p13, %p832_p12 }
  0x4b   :  { %622 = vmatprep.subr.bf16.mxu0 %v862_v0  ;;  %635 = vmatpush3.bf16.msra.mxu1 %v706_v13 }
  0x4c   :  { %636 = vmatprep.subr.bf16.mxu1 %v862_v0  ;;  %p835_p1 = pnand %p834_p0, %p828_p11 }
  0x4e   :  { %623 = vmatpush3.bf16.msra.mxu0 %v702_v10 }
  0x4f   :  { %648 = vmatprep.subr.bf16.mxu0 %v862_v0  ;;  %637 = vmatpush3.bf16.msra.mxu1 %v707_v15 }
  0x50   :  { %638 = vmatprep.subr.bf16.mxu1 %v862_v0 }
  0x51   :  { %625 = vmatmul.mubr.msk.bf16.vlgmr.msra.gmra.mxu0 %vm140_vm3, %v101_v14 }
  0x52   :  { %664 = vmatprep.mubr.msk.bf16.mxu0 %vm863_vm1, %v862_v0  ;;  %649 = vmatpush3.bf16.msra.mxu0 %v711_v19 }
  0x53   :  { %639 = vmatpush3.bf16.msra.mxu1 %v708_v16  ;;  %650 = vmatprep.subr.bf16.mxu0 %v862_v0 }
  0x54   :  { %640 = vmatprep.subr.bf16.mxu1 %v862_v0 }
  0x56   :  { %651 = vmatpush3.bf16.msra.mxu0 %v712_v20 }
  0x57   :  { %641 = vmatpush3.bf16.msra.mxu1 %v709_v17  ;;  %652 = vmatprep.subr.bf16.mxu0 %v862_v0 }
  0x58   :  { %642 = vmatprep.subr.bf16.mxu1 %v862_v0 }
  0x5a   :  { %653 = vmatpush3.bf16.msra.mxu0 %v713_v21 }
  0x5b   :  { %643 = vmatpush3.bf16.msra.mxu1 %v710_v18  ;;  %654 = vmatprep.subr.bf16.mxu0 %v862_v0 }
  0x5c   :  { %668 = vmatprep.subr.bf16.mxu1 %v862_v0 }
  0x5e   :  { %655 = vmatpush3.bf16.msra.mxu0 %v714_v22 }
  0x5f   :  { %656 = vmatprep.subr.bf16.mxu0 %v862_v0 }
  0x62   :  { %657 = vmatpush3.bf16.msra.mxu0 %v715_v23 }
  0x63   :  { %658 = vmatprep.subr.bf16.mxu0 %v862_v0 }
  0x66   :  { %659 = vmatpush3.bf16.msra.mxu0 %v716_v24 }
  0x67   :  { %660 = vmatprep.subr.bf16.mxu0 %v862_v0 }
  0x6a   :  { %661 = vmatpush3.bf16.msra.mxu0 %v717_v34 }
  0x6b   :  { %662 = vmatprep.subr.bf16.mxu0 %v862_v0 }
  0x6e   :  { %663 = vmatpush3.bf16.msra.mxu0 %v718_v35 }
 0x111   :  { %v185_v26 = vpop.f32.mrf.mxu0 }
 0x112   :  { %v186_v27 = vadd.f32 %v551_v25, %v185_v26 }
 0x113   :  { %v626_v28 = vpop.f32.mrf.mxu0 }
 0x114   :  { %v191_v29 = vmul.f32 0.01, %v186_v27 }
 0x115   :  { %v188_v30 = vpop.f32.mrf.mxu0 }
 0x116   :  { %v192_v31 = vmax.f32 %v186_v27, %v191_v29 }
 0x117   :  { %v627_v32 = vpop.f32.mrf.mxu0 }
 0x118   :  { %v193_v33 = vpack.c.bf16 %v192_v31, %v192_v31 }
 0x11a   :  { %645 = vmatmul.mubr.bf16.vlgmr.msra.gmra.mxu1 %v193_v33 }
 0x11b   :  { %684 = vmatprep.mubr.msk.bf16.mxu1 %vm863_vm1, %v862_v0  ;;  %669 = vmatpush3.bf16.msra.mxu1 %v719_v36 }
 0x11c   :  { %670 = vmatprep.subr.bf16.mxu1 %v862_v0 }
 0x11f   :  { %671 = vmatpush3.bf16.msra.mxu1 %v720_v37 }
 0x120   :  { %672 = vmatprep.subr.bf16.mxu1 %v862_v0 }
 0x123   :  { %673 = vmatpush3.bf16.msra.mxu1 %v721_v38 }
 0x124   :  { %674 = vmatprep.subr.bf16.mxu1 %v862_v0 }
 0x127   :  { %675 = vmatpush3.bf16.msra.mxu1 %v722_v39 }
 0x128   :  { %676 = vmatprep.subr.bf16.mxu1 %v862_v0 }
 0x12b   :  { %677 = vmatpush3.bf16.msra.mxu1 %v723_v40 }
 0x12c   :  { %678 = vmatprep.subr.bf16.mxu1 %v862_v0 }
 0x12f   :  { %679 = vmatpush3.bf16.msra.mxu1 %v724_v41 }
 0x130   :  { %680 = vmatprep.subr.bf16.mxu1 %v862_v0 }
 0x133   :  { %681 = vmatpush3.bf16.msra.mxu1 %v725_v51 }
 0x134   :  { %682 = vmatprep.subr.bf16.mxu1 %v862_v0 }
 0x137   :  { %683 = vmatpush3.bf16.msra.mxu1 %v726_v52 }
 0x1da   :  { %v299_v43 = vpop.f32.mrf.mxu1 }
 0x1db   :  { %v300_v44 = vadd.f32 %v557_v42, %v299_v43 }
 0x1dc   :  { %v646_v45 = vpop.f32.mrf.mxu1 }
 0x1dd   :  { %v305_v46 = vmul.f32 0.01, %v300_v44 }
 0x1de   :  { %v302_v47 = vpop.f32.mrf.mxu1 }
 0x1df   :  { %v306_v48 = vmax.f32 %v300_v44, %v305_v46 }
 0x1e0   :  { %v647_v49 = vpop.f32.mrf.mxu1 }
 0x1e1   :  { %v307_v50 = vpack.c.bf16 %v306_v48, %v306_v48 }
 0x1e3   :  { %665 = vmatmul.mubr.bf16.vlgmr.msra.gmra.mxu0 %v307_v50 }
 0x2a3   :  { %v413_v54 = vpop.f32.mrf.mxu0 }
 0x2a4   :  { %v414_v55 = vadd.f32 %v566_v53, %v413_v54 }
 0x2a5   :  { %v666_v56 = vpop.f32.mrf.mxu0 }
 0x2a6   :  { %v419_v57 = vmul.f32 0.01, %v414_v55 }
 0x2a7   :  { %v416_v58 = vpop.f32.mrf.mxu0 }
 0x2a8   :  { %v420_v59 = vmax.f32 %v414_v55, %v419_v57 }
 0x2a9   :  { %v667_v60 = vpop.f32.mrf.mxu0 }
 0x2aa   :  { %v421_v61 = vpack.c.bf16 %v420_v59, %v420_v59 }
 0x2ac   :  { %685 = vmatmul.mubr.bf16.vlgmr.msra.gmra.mxu1 %v421_v61 }
 0x36c   :  { %v527_v63 = vpop.f32.mrf.mxu1 }
 0x36d   :  { %v528_v0 = vadd.f32 %v575_v62, %v527_v63 }
 0x36e   :  { %v686_v1 = vpop.f32.mrf.mxu1 }
 0x36f   :  { %533 = vst [vmem:[#allocation11] sm:$0xff] %v528_v0 }
 0x370   :  { %v530_v2 = vpop.f32.mrf.mxu1 }
 0x371   :  { %838 = shalt.err (!%p835_p1)
}
 0x372   :  { %543 = dma.vmem_to_hbm [thread:$0]  %s541_s17, 128, %s1003_s9, [#allocation4]   ;;  %v687_v3 = vpop.f32.mrf.mxu1 }
 0x373   :  { %853 = dma.done.wait [#allocation4], 128  }
 0x374   :  { %854 = vsyncadd [#allocation4], 4294967168 }
 0x375   :  { %547 = vsyncpa [#allocation3], 1 }
 0x376   :  { %548 = vsyncpa [#allocation6], 1 }
 0x377   :  { %549 = vsyncpa [#allocation9], 1 }
 0x378   :  { %550 = vsyncpa [#allocation4], 1 }

</bundles_post_ra>
